<compile_context>
chip_gen: v6e
topology: v6e:2x2x1
jax: 0.10.0
libtpu: 0.0.40
codegen_flags: <defaults>
</compile_context>

<pallas_src>
import jax
import jax.numpy as jnp
from jax.experimental import pallas as pl
from jax.experimental.pallas import tpu as pltpu


def linear_kernel(x_ref, p_ref, o_ref):
    # x_ref: (tm, 2) in VMEM
    # p_ref: (3,)    in SMEM, f32 = [w00, w01, bias]
    # o_ref: (tm, 1) in VMEM
    w0 = p_ref[0]
    w1 = p_ref[1]
    b = p_ref[2]
    x = x_ref[...].astype(jnp.float32)
    # Pure VPU math: two muls + two adds per vreg; no MXU, no transpose.
    y = x[:, 0:1] * w0 + x[:, 1:2] * w1 + b
    o_ref[...] = y.astype(o_ref.dtype)


def linear_forward(x, weight, bias, *, block_b=1024):
    """y = x @ weight.T + bias (nn.Linear(2, 1) semantics), as a Pallas kernel.

    NOTE: for a standalone 8x2 linear layer an XLA fusion would beat any
    custom call (launch-latency bound); this kernel is the building block for
    fusing this layer into larger Pallas kernels.
    """
    B, Fin = x.shape
    Fout = weight.shape[0]
    assert Fin == 2 and Fout == 1, "Model is nn.Linear(2, 1)"

    # Flatten params to a single 1-D f32 array -> cheap SMEM residency
    # (1-D avoids the [8,128]-word 2-D SMEM padding).
    params = jnp.concatenate(
        [weight.reshape(-1), bias.reshape(-1)]
    ).astype(jnp.float32)  # (3,) = [w00, w01, b]

    if B <= block_b:
        # Grid-less call: no grid pipeline prologue/epilogue, single invocation,
        # full arrays as the (only) block.
        return pl.pallas_call(
            linear_kernel,
            out_shape=jax.ShapeDtypeStruct((B, Fout), x.dtype),
            in_specs=[
                pl.BlockSpec(memory_space=pltpu.MemorySpace.VMEM),
                pl.BlockSpec(memory_space=pltpu.MemorySpace.SMEM),
            ],
            out_specs=pl.BlockSpec(memory_space=pltpu.MemorySpace.VMEM),
        )(x, params)

    # Large batch: tile only the batch axis with big blocks (multiple of 8),
    # batch axis marked "parallel" so v7x can shard it across its 2 TCs.
    # block_b=1024 keeps double-buffered VMEM usage tiny (<64 KiB), well under
    # v7x's 32 MiB scoped / 64 MiB physical VMEM.
    num_blocks = pl.cdiv(B, block_b)
    Bp = num_blocks * block_b
    xp = x if Bp == B else jnp.pad(x, ((0, Bp - B), (0, 0)))
    yp = pl.pallas_call(
        linear_kernel,
        out_shape=jax.ShapeDtypeStruct((Bp, Fout), x.dtype),
        grid=(num_blocks,),
        in_specs=[
            pl.BlockSpec((block_b, Fin), lambda i: (i, 0)),
            pl.BlockSpec(memory_space=pltpu.MemorySpace.SMEM),
        ],
        out_specs=pl.BlockSpec((block_b, Fout), lambda i: (i, 0)),
        compiler_params=pltpu.CompilerParams(
            dimension_semantics=("parallel",)
        ),
    )(xp, params)
    return yp[:B]


def init_params(key, in_features=2, out_features=1):
    """Deterministic init mimicking nn.Linear's uniform(-1/sqrt(fan_in), 1/sqrt(fan_in))."""
    kw, kb = jax.random.split(key)
    bound = 1.0 / jnp.sqrt(jnp.float32(in_features))
    weight = jax.random.uniform(
        kw, (out_features, in_features), jnp.float32, -bound, bound
    )
    bias = jax.random.uniform(kb, (out_features,), jnp.float32, -bound, bound)
    return weight, bias


if __name__ == "__main__":
    key = jax.random.PRNGKey(0)
    k_params, k_x = jax.random.split(key)

    # Small batch of 2-feature inputs (what nn.Linear(2, 1) implies).
    batch = 8
    x = jax.random.normal(k_x, (batch, 2), dtype=jnp.float32)

    weight, bias = init_params(k_params)

    y = linear_forward(x, weight, bias)
    y = jax.block_until_ready(y)

    # Reference check in plain JAX.
    y_ref = x @ weight.T + bias[None, :]
    assert y.shape == (batch, 1)
    assert jnp.allclose(y, y_ref, atol=1e-5, rtol=1e-5)

    print("KERNEL_OK")
</pallas_src>

<mosaic_0001>
module attributes {stable_mosaic.version = 11 : i64} {
  func.func @linear_kernel(%arg0: memref<8x2xf32, #tpu.memory_space<vmem>>, %arg1: memref<3xf32, #tpu.memory_space<smem>>, %arg2: memref<8x1xf32, #tpu.memory_space<vmem>>) attributes {dimension_semantics = [], scalar_prefetch = 0 : i64, scratch_operands = 0 : i64, tpu.core_type = #tpu.core_type<tc>} {
    %c0 = arith.constant 0 : index
    %0 = memref.load %arg1[%c0] : memref<3xf32, #tpu.memory_space<smem>>
    %c1 = arith.constant 1 : index
    %1 = memref.load %arg1[%c1] : memref<3xf32, #tpu.memory_space<smem>>
    %c2 = arith.constant 2 : index
    %2 = memref.load %arg1[%c2] : memref<3xf32, #tpu.memory_space<smem>>
    %c0_0 = arith.constant 0 : index
    %c0_1 = arith.constant 0 : index
    %3 = vector.load %arg0[%c0_0, %c0_1] : memref<8x2xf32, #tpu.memory_space<vmem>>, vector<8x2xf32>
    %4 = vector.extract_strided_slice %3 {offsets = [0, 0], sizes = [8, 1], strides = [1, 1]} : vector<8x2xf32> to vector<8x1xf32>
    %5 = vector.broadcast %0 : f32 to vector<8x1xf32>
    %6 = arith.mulf %4, %5 : vector<8x1xf32>
    %7 = vector.extract_strided_slice %3 {offsets = [0, 1], sizes = [8, 1], strides = [1, 1]} : vector<8x2xf32> to vector<8x1xf32>
    %8 = vector.broadcast %1 : f32 to vector<8x1xf32>
    %9 = arith.mulf %7, %8 : vector<8x1xf32>
    %10 = arith.addf %6, %9 : vector<8x1xf32>
    %11 = vector.broadcast %2 : f32 to vector<8x1xf32>
    %12 = arith.addf %10, %11 : vector<8x1xf32>
    %c0_2 = arith.constant 0 : index
    %c0_3 = arith.constant 0 : index
    %13 = vector.load %arg2[%c0_2, %c0_3] : memref<8x1xf32, #tpu.memory_space<vmem>>, vector<8x1xf32>
    tpu.vector_store %arg2[%c0_2, %c0_3], %12 {strides = array<i32>} : memref<8x1xf32, #tpu.memory_space<vmem>>, vector<8x1xf32>,
    return
  }
}

</mosaic_0001>

<bundles_post_ra>
// kernel: tpu_custom_call.1
= control target key start
LH: loop header
LB: loop body
LE: loop exit
PB: predicated region body
PF: predicated region fallthrough
CT: control target
= control target key end

     0   :  { %7 = vsyncpa [#allocation3], 0  ;;  %s90_s0 = inlined_call_operand.vmem [shape: f32[8,2], index: 0, kind: input, shape index: {}]   ;;  %s91_s1 = inlined_call_operand.vmem [shape: f32[3], index: 1, kind: input, shape index: {}]   ;;  %s92_s2 = inlined_call_operand.vmem [shape: f32[8,1], index: 2, kind: output, shape index: {}]  }
   0x1   :  { %s16_s11 = sshll.u32 %s91_s1, 4  ;;  %s17_s11 = int_to_ptr.vmem [resolvable:$true] %s16_s11 }
   0x2   :  { %s50_s12 = scalar_lea.vmem %s17_s11, 16  ;;  %p55_p1 = scmp.lt.s32.totalorder %s17_s11, %s17_s11 }
   0x3   :  { %p51_p0 = scmp.ne.s32.totalorder %s17_s11, %s50_s12  ;;  %p56_p2 = scmp.lt.s32.totalorder %s50_s12, %s50_s12 }
   0x5   :  { %p57_p3 = por %p56_p2, %p55_p1 }
   0x7   :  { %p58_p4 = pnand %p57_p3, %p51_p0 }
   0x9   :  { %61 = shalt.err (!%p58_p4)
}
   0xa   :  { %s64_s13 = smov [#allocation2]  }
   0xb   :  { %19 = dma.vmem_to_smem %s17_s11, 16, %s64_s13, [#allocation3]  }
   0xc   :  { %62 = dma.done.wait [#allocation3], 16  }
   0xd   :  { %63 = vsyncadd [#allocation3], 4294967280 }
   0xe   :  { %23 = sfence }
   0xf   :  { %s46_s14 = sld [smem:[#allocation2 + $0x1]]  ;;  %v27_v0 = vld [vmem:[%s90_s0] sm:$0xff]  ;;  %s65_s1 = smov 127   ;;  %vm39_vm0 = vcmask 7168  }
  0x10   :  { %s24_s17 = sld [smem:[#allocation2]] }
  0x11   :  { %s47_s18 = sld [smem:[#allocation2 + $0x2]] }
  0x15   :  { %v30_v1 = vstv %s46_s14 }
  0x16   :  { %v31_v2 = vmul.f32 %v30_v1, %v27_v0  ;;  %v28_v3 = vstv %s24_s17 }
  0x17   :  { %v29_v4 = vmul.f32 %v28_v3, %v27_v0  ;;  %v37_v6 = vstv %s47_s18 }
  0x18   :  { %33 = vrot.lane.b32.xlu0 %v31_v2, %s65_s1 }
  0x8a   :  { %v34_v5 = vpop.permute.xlu0 %33 }
  0x8b   :  { %v36_v7 = vadd.f32 %v34_v5, %v29_v4 }
  0x8d   :  { %v38_v8 = vadd.f32 %v37_v6, %v36_v7 }
  0x8f   :  { %40 = vst.msk [vmem:[%s92_s2] sm:$0xff] %vm39_vm0, %v38_v8 }
  0x90   :  { %45 = vsyncpa [#allocation3], 1 }

</bundles_post_ra>
